<compile_context>
chip_gen: v5e
topology: v5e:2x2
jax: 0.10.0
libtpu: 0.0.40
codegen_flags: <defaults>
</compile_context>

<pallas_src>
import functools

import jax
import jax.numpy as jnp
from jax.experimental import pallas as pl
from jax.experimental.pallas import tpu as pltpu


def _round_up(n, m):
    return ((n + m - 1) // m) * m


def _self_attention_kernel(x_ref, wpT_ref, bp_ref, wuT_ref, bu_ref,
                           out_ref, wts_ref, *, s_real):
    # x_ref: (TB, S_pad, H); wpT/wuT: (H, H) pre-transposed; bp/bu: (1, H) f32
    TB, S_pad, H = x_ref.shape
    half = H // 2
    Hp = out_ref.shape[-1]
    Sp = wts_ref.shape[-1]

    # projection on the whole batch block: tanh((TB*S_pad, H) @ (H, H) + bp).
    # The reshape is a free relayout because the wrapper padded S to the
    # sublane pack of x.dtype.
    x = x_ref[...]
    x2 = x.reshape(TB * S_pad, H)
    u_it = jnp.tanh(
        jnp.dot(x2, wpT_ref[...], preferred_element_type=jnp.float32)
        + bp_ref[...])
    u_it = u_it.reshape(TB, S_pad, H)                 # (TB, S_pad, H) f32

    # represent = concat(x[:, -1, :H//2], x[:, 1, H//2:]) via a lane select
    x_last = x_ref[:, s_real - 1, :]                  # (TB, H)
    x_one = x_ref[:, 1, :]                            # (TB, H)
    col = jax.lax.broadcasted_iota(jnp.int32, (TB, H), 1)
    represent = jnp.where(col < half, x_last, x_one)  # (TB, H), x dtype

    # u_w = tanh(represent @ Wu^T + bu)
    u_w = jnp.tanh(
        jnp.dot(represent, wuT_ref[...], preferred_element_type=jnp.float32)
        + bu_ref[...])                                # (TB, H) f32

    # attention scores: contract over H without transposing u_it
    scores = jnp.sum(u_it * u_w[:, None, :], axis=-1)  # (TB, S_pad) f32
    if S_pad != s_real:
        lane = jax.lax.broadcasted_iota(jnp.int32, scores.shape, 1)
        scores = jnp.where(lane < s_real, scores, -jnp.inf)

    # softmax over the sequence axis; EUP reciprocal + one Newton refinement
    m = jnp.max(scores, axis=-1, keepdims=True)
    e = jnp.exp(scores - m)
    s = jnp.sum(e, axis=-1, keepdims=True)
    inv = pl.reciprocal(s, approx=True)
    inv = inv * (2.0 - s * inv)                       # Newton step -> full f32
    wts = e * inv                                     # (TB, S_pad) f32

    # weighted sum of encoder outputs on the MXU: (TB,1,S)x(TB,S,H) -> (TB,H).
    # Re-read x from the ref (VMEM) instead of reusing the value captured at
    # the top -> shorter live ranges, no cross-lane broadcast of wts.
    x_again = x_ref[...]
    out = jnp.einsum(
        "bqs,bsh->bqh",
        wts[:, None, :].astype(x_again.dtype), x_again,
        preferred_element_type=jnp.float32)[:, 0, :]  # (TB, H) f32

    # lane-dense padded stores (no masked vst when H or S is narrow)
    if Hp != H:
        out = jnp.concatenate(
            [out, jnp.zeros((TB, Hp - H), out.dtype)], axis=-1)
    if Sp != S_pad:
        wts = jnp.concatenate(
            [wts, jnp.zeros((TB, Sp - S_pad), wts.dtype)], axis=-1)

    out_ref[...] = out.astype(out_ref.dtype)          # (TB, Hp)
    wts_ref[...] = wts.astype(wts_ref.dtype)          # (TB, Sp)


def _vmem_limit_and_budget():
    """Scoped-VMEM limit to request, and the planning budget for tiles."""
    try:
        phys = int(pltpu.get_tpu_info().vmem_capacity_bytes)
    except Exception:
        phys = 64 * 1024 * 1024  # conservative: v7x physical per-TC VMEM
    limit = int(phys * 0.9)      # raise the scoped limit toward physical
    budget = int(limit * 0.75)   # headroom for compiler scratch / spills
    return limit, budget


def _choose_tb(B, S_pad, H, x_itemsize, budget_bytes):
    """Largest batch tile whose working set fits the VMEM budget."""
    Hp = _round_up(H, 128)
    Sp = _round_up(S_pad, 128)
    # weights + biases, double-buffered (constant index_map, kept simple)
    fixed = 2 * (2 * H * H + 2 * H) * x_itemsize
    per_row = (2 * S_pad * H * x_itemsize      # x block, double-buffered
               + 2 * S_pad * H * 4             # u_it f32 + elementwise temps
               + 2 * (Hp * x_itemsize + Sp * 4))  # out/wts blocks, dbl-buffered
    max_tb = max(1, (budget_bytes - fixed) // per_row)

    divisors = [d for d in range(1, B + 1) if B % d == 0 and d <= max_tb]
    if not divisors:
        return 1
    # prefer sublane-aligned tiles that still give >= 2 grid steps (v7x TCs);
    # otherwise take the whole batch in one step (v5e/v6e: fewer steps).
    pref = [d for d in divisors if d % 8 == 0 and d < B]
    if pref:
        return max(pref)
    return max(divisors)


def self_attention(x, wp, bp, wu, bu, *, tb=None, stream_dtype=None):
    B, S, H = x.shape
    assert S >= 2, "module hard-codes encoder_outputs[:, 1, :]; needs S >= 2"

    # optional narrow streaming dtype (e.g. bf16): cast once, accumulate f32
    if stream_dtype is not None:
        x = x.astype(stream_dtype)
        wp = wp.astype(stream_dtype)
        wu = wu.astype(stream_dtype)

    itemsize = x.dtype.itemsize
    pack = max(8, 32 // itemsize)            # sublane pack: 8 f32, 16 bf16
    S_pad = _round_up(S, pack)
    if S_pad != S:
        x = jnp.pad(x, ((0, 0), (0, S_pad - S), (0, 0)))

    Hp = _round_up(H, 128)
    Sp = _round_up(S_pad, 128)

    limit, budget = _vmem_limit_and_budget()
    if tb is None:
        tb = _choose_tb(B, S_pad, H, itemsize, budget)
    assert B % tb == 0, "batch must be divisible by the batch tile"
    grid = (B // tb,)

    # one-time XLA-side transposes / reshapes (kept out of the kernel loop)
    wpT = wp.T
    wuT = wu.T
    bp2 = bp.reshape(1, H).astype(jnp.float32)
    bu2 = bu.reshape(1, H).astype(jnp.float32)

    w_itemsize = wpT.dtype.itemsize
    cost = pl.CostEstimate(
        flops=2 * B * S_pad * H * H + 2 * B * H * H + 4 * B * S_pad * H,
        transcendentals=B * S_pad * H + B * H + B * S_pad,
        bytes_accessed=(B * S_pad * H * itemsize
                        + 2 * H * H * w_itemsize + 2 * H * 4
                        + B * Hp * itemsize + B * Sp * 4),
    )

    kern = functools.partial(_self_attention_kernel, s_real=S)

    out_p, wts_p = pl.pallas_call(
        kern,
        out_shape=(jax.ShapeDtypeStruct((B, Hp), x.dtype),
                   jax.ShapeDtypeStruct((B, Sp), jnp.float32)),
        grid=grid,
        in_specs=[
            pl.BlockSpec((tb, S_pad, H), lambda b: (b, 0, 0)),
            pl.BlockSpec((H, H), lambda b: (0, 0)),
            pl.BlockSpec((1, H), lambda b: (0, 0)),
            pl.BlockSpec((H, H), lambda b: (0, 0)),
            pl.BlockSpec((1, H), lambda b: (0, 0)),
        ],
        out_specs=(
            pl.BlockSpec((tb, Hp), lambda b: (b, 0)),
            pl.BlockSpec((tb, Sp), lambda b: (b, 0)),
        ),
        compiler_params=pltpu.CompilerParams(
            dimension_semantics=("parallel",),
            vmem_limit_bytes=limit),
        cost_estimate=cost,
    )(x, wpT, bp2, wuT, bu2)

    # slice the lane-dense padded slabs back to the torch .squeeze() shapes
    return out_p[:, :H], wts_p[:, :S]


def self_attention_ref(x, wp, bp, wu, bu):
    B, S, H = x.shape
    half = H // 2
    u_it = jnp.tanh(x @ wp.T + bp)                                   # (B,S,H)
    represent = jnp.concatenate([x[:, -1, :half], x[:, 1, half:]], -1)
    u_w = jnp.tanh(represent @ wu.T + bu)                            # (B,H)
    scores = jnp.einsum("bsh,bh->bs", u_it, u_w)
    wts = jax.nn.softmax(scores, axis=-1)
    out = jnp.einsum("bsh,bs->bh", x, wts)
    return out, wts


if __name__ == "__main__":
    B, S, H = 2, 8, 32
    key = jax.random.PRNGKey(0)
    kx, k1, k2, k3, k4 = jax.random.split(key, 5)

    x = jax.random.normal(kx, (B, S, H), dtype=jnp.float32)
    bound = 1.0 / jnp.sqrt(H)
    wp = jax.random.uniform(k1, (H, H), jnp.float32, -bound, bound)
    bp = jax.random.uniform(k2, (H,), jnp.float32, -bound, bound)
    wu = jax.random.uniform(k3, (H, H), jnp.float32, -bound, bound)
    bu = jax.random.uniform(k4, (H,), jnp.float32, -bound, bound)

    out, wts = self_attention(x, wp, bp, wu, bu)
    jax.block_until_ready((out, wts))

    out_ref, wts_ref = self_attention_ref(x, wp, bp, wu, bu)
    assert out.shape == (B, H) and wts.shape == (B, S)
    assert jnp.allclose(out, out_ref, atol=1e-4, rtol=1e-4)
    assert jnp.allclose(wts, wts_ref, atol=1e-4, rtol=1e-4)

    print("KERNEL_OK")
</pallas_src>

<mosaic_0001>
module attributes {stable_mosaic.version = 11 : i64} {
  func.func @_self_attention_kernel(%arg0: i32, %arg1: memref<2x8x32xf32, #tpu.memory_space<vmem>>, %arg2: memref<32x32xf32, #tpu.memory_space<vmem>>, %arg3: memref<1x32xf32, #tpu.memory_space<vmem>>, %arg4: memref<32x32xf32, #tpu.memory_space<vmem>>, %arg5: memref<1x32xf32, #tpu.memory_space<vmem>>, %arg6: memref<2x128xf32, #tpu.memory_space<vmem>>, %arg7: memref<2x128xf32, #tpu.memory_space<vmem>>) attributes {dimension_semantics = [#tpu.dimension_semantics<parallel>], iteration_bounds = array<i64: 1>, scalar_prefetch = 0 : i64, scratch_operands = 0 : i64, tpu.core_type = #tpu.core_type<tc>, window_params = [{transform_indices = @transform_0, window_bounds = array<i64: 2, 8, 32>}, {pipeline_mode = #tpu.pipeline_mode<synchronous>, transform_indices = @transform_1, window_bounds = array<i64: 32, 32>}, {pipeline_mode = #tpu.pipeline_mode<synchronous>, transform_indices = @transform_2, window_bounds = array<i64: 1, 32>}, {pipeline_mode = #tpu.pipeline_mode<synchronous>, transform_indices = @transform_3, window_bounds = array<i64: 32, 32>}, {pipeline_mode = #tpu.pipeline_mode<synchronous>, transform_indices = @transform_4, window_bounds = array<i64: 1, 32>}, {transform_indices = @transform_5, window_bounds = array<i64: 2, 128>}, {transform_indices = @transform_6, window_bounds = array<i64: 2, 128>}]} {
    %c0 = arith.constant 0 : index
    %c0_0 = arith.constant 0 : index
    %c0_1 = arith.constant 0 : index
    %0 = vector.load %arg1[%c0, %c0_0, %c0_1] : memref<2x8x32xf32, #tpu.memory_space<vmem>>, vector<2x8x32xf32>
    %1 = vector.shape_cast %0 : vector<2x8x32xf32> to vector<16x32xf32>
    %c0_2 = arith.constant 0 : index
    %c0_3 = arith.constant 0 : index
    %2 = vector.load %arg2[%c0_2, %c0_3] : memref<32x32xf32, #tpu.memory_space<vmem>>, vector<32x32xf32>
    %cst = arith.constant dense<0.000000e+00> : vector<16x32xf32>
    %3 = tpu.matmul %1, %2, %cst {dimension_numbers = #tpu.dot_dimension_numbers<[1], [0], [0], [1], [0, 0, 1, 1], [], []>} : vector<16x32xf32>, vector<32x32xf32>, vector<16x32xf32> -> vector<16x32xf32>
    %c0_4 = arith.constant 0 : index
    %c0_5 = arith.constant 0 : index
    %4 = vector.load %arg3[%c0_4, %c0_5] : memref<1x32xf32, #tpu.memory_space<vmem>>, vector<1x32xf32>
    %5 = vector.broadcast %4 : vector<1x32xf32> to vector<16x32xf32>
    %6 = arith.addf %3, %5 : vector<16x32xf32>
    %7 = math.tanh %6 : vector<16x32xf32>
    %8 = vector.shape_cast %7 : vector<16x32xf32> to vector<2x8x32xf32>
    %c0_6 = arith.constant 0 : index
    %c7 = arith.constant 7 : index
    %c0_7 = arith.constant 0 : index
    %9 = vector.load %arg1[%c0_6, %c7, %c0_7] : memref<2x8x32xf32, #tpu.memory_space<vmem>>, vector<2x1x32xf32>
    %10 = vector.shape_cast %9 : vector<2x1x32xf32> to vector<2x32xf32>
    %c0_8 = arith.constant 0 : index
    %c1 = arith.constant 1 : index
    %c0_9 = arith.constant 0 : index
    %11 = vector.load %arg1[%c0_8, %c1, %c0_9] : memref<2x8x32xf32, #tpu.memory_space<vmem>>, vector<2x1x32xf32>
    %12 = vector.shape_cast %11 : vector<2x1x32xf32> to vector<2x32xf32>
    %13 = tpu.iota {dimensions = array<i32: 1>} : vector<2x32xi32>
    %c16_i32 = arith.constant 16 : i32
    %14 = vector.broadcast %c16_i32 : i32 to vector<2x32xi32>
    %15 = arith.cmpi slt, %13, %14 : vector<2x32xi32>
    %16 = arith.select %15, %10, %12 : vector<2x32xi1>, vector<2x32xf32>
    %c0_10 = arith.constant 0 : index
    %c0_11 = arith.constant 0 : index
    %17 = vector.load %arg4[%c0_10, %c0_11] : memref<32x32xf32, #tpu.memory_space<vmem>>, vector<32x32xf32>
    %cst_12 = arith.constant dense<0.000000e+00> : vector<2x32xf32>
    %18 = tpu.matmul %16, %17, %cst_12 {dimension_numbers = #tpu.dot_dimension_numbers<[1], [0], [0], [1], [0, 0, 1, 1], [], []>} : vector<2x32xf32>, vector<32x32xf32>, vector<2x32xf32> -> vector<2x32xf32>
    %c0_13 = arith.constant 0 : index
    %c0_14 = arith.constant 0 : index
    %19 = vector.load %arg5[%c0_13, %c0_14] : memref<1x32xf32, #tpu.memory_space<vmem>>, vector<1x32xf32>
    %20 = vector.broadcast %19 : vector<1x32xf32> to vector<2x32xf32>
    %21 = arith.addf %18, %20 : vector<2x32xf32>
    %22 = math.tanh %21 : vector<2x32xf32>
    %23 = vector.shape_cast %22 : vector<2x32xf32> to vector<2x1x32xf32>
    %24 = vector.broadcast %23 : vector<2x1x32xf32> to vector<2x8x32xf32>
    %25 = arith.mulf %8, %24 : vector<2x8x32xf32>
    %cst_15 = arith.constant dense<0.000000e+00> : vector<2x8xf32>
    %26 = vector.multi_reduction <add>, %25, %cst_15 [2] : vector<2x8x32xf32> to vector<2x8xf32>
    %cst_16 = arith.constant dense<0xFF800000> : vector<2xf32>
    %27 = vector.multi_reduction <maximumf>, %26, %cst_16 [1] : vector<2x8xf32> to vector<2xf32>
    %28 = vector.shape_cast %27 : vector<2xf32> to vector<2x1xf32>
    %29 = vector.broadcast %28 : vector<2x1xf32> to vector<2x8xf32>
    %30 = arith.subf %26, %29 : vector<2x8xf32>
    %31 = math.exp %30 : vector<2x8xf32>
    %cst_17 = arith.constant dense<0.000000e+00> : vector<2xf32>
    %32 = vector.multi_reduction <add>, %31, %cst_17 [1] : vector<2x8xf32> to vector<2xf32>
    %33 = vector.shape_cast %32 : vector<2xf32> to vector<2x1xf32>
    %34 = tpu.reciprocal %33 {approx = true} : vector<2x1xf32> -> vector<2x1xf32>
    %35 = arith.mulf %33, %34 : vector<2x1xf32>
    %cst_18 = arith.constant 2.000000e+00 : f32
    %36 = vector.broadcast %cst_18 : f32 to vector<2x1xf32>
    %37 = arith.subf %36, %35 : vector<2x1xf32>
    %38 = arith.mulf %34, %37 : vector<2x1xf32>
    %39 = vector.broadcast %38 : vector<2x1xf32> to vector<2x8xf32>
    %40 = arith.mulf %31, %39 : vector<2x8xf32>
    %c0_19 = arith.constant 0 : index
    %c0_20 = arith.constant 0 : index
    %c0_21 = arith.constant 0 : index
    %41 = vector.load %arg1[%c0_19, %c0_20, %c0_21] : memref<2x8x32xf32, #tpu.memory_space<vmem>>, vector<2x8x32xf32>
    %42 = vector.shape_cast %40 : vector<2x8xf32> to vector<2x1x8xf32>
    "tpu.trace_start"() <{level = 10 : i32, message = "bqs,bsh->bqh"}> : () -> ()
    %cst_22 = arith.constant dense<0.000000e+00> : vector<2x1x32xf32>
    %43 = tpu.matmul %42, %41, %cst_22 {dimension_numbers = #tpu.dot_dimension_numbers<[2], [1], [1], [2], [0, 0, 0, 1, 1, 2], [0], [0]>} : vector<2x1x8xf32>, vector<2x8x32xf32>, vector<2x1x32xf32> -> vector<2x1x32xf32>
    "tpu.trace_stop"() : () -> ()
    %44 = vector.shape_cast %43 : vector<2x1x32xf32> to vector<2x32xf32>
    %cst_23 = arith.constant 0.000000e+00 : f32
    %45 = vector.broadcast %cst_23 : f32 to vector<2x96xf32>
    %46 = tpu.concatenate %44, %45 in 1 : vector<2x32xf32>, vector<2x96xf32> -> vector<2x128xf32>
    %cst_24 = arith.constant 0.000000e+00 : f32
    %47 = vector.broadcast %cst_24 : f32 to vector<2x120xf32>
    %48 = tpu.concatenate %40, %47 in 1 : vector<2x8xf32>, vector<2x120xf32> -> vector<2x128xf32>
    %c0_25 = arith.constant 0 : index
    %c0_26 = arith.constant 0 : index
    %49 = vector.load %arg6[%c0_25, %c0_26] : memref<2x128xf32, #tpu.memory_space<vmem>>, vector<2x128xf32>
    tpu.vector_store %arg6[%c0_25, %c0_26], %46 {strides = array<i32>} : memref<2x128xf32, #tpu.memory_space<vmem>>, vector<2x128xf32>,
    %c0_27 = arith.constant 0 : index
    %c0_28 = arith.constant 0 : index
    %50 = vector.load %arg7[%c0_27, %c0_28] : memref<2x128xf32, #tpu.memory_space<vmem>>, vector<2x128xf32>
    tpu.vector_store %arg7[%c0_27, %c0_28], %48 {strides = array<i32>} : memref<2x128xf32, #tpu.memory_space<vmem>>, vector<2x128xf32>,
    return
  }
  func.func @transform_0(%arg0: i32) -> (i32, i32, i32) {
    %c0_i32 = arith.constant 0 : i32
    %c0_i32_0 = arith.constant 0 : i32
    %c0_i32_1 = arith.constant 0 : i32
    return %arg0, %c0_i32, %c0_i32_0 : i32, i32, i32
  }
  func.func @transform_1(%arg0: i32) -> (i32, i32) {
    %c0_i32 = arith.constant 0 : i32
    %c0_i32_0 = arith.constant 0 : i32
    %c0_i32_1 = arith.constant 0 : i32
    return %c0_i32, %c0_i32_0 : i32, i32
  }
  func.func @transform_2(%arg0: i32) -> (i32, i32) {
    %c0_i32 = arith.constant 0 : i32
    %c0_i32_0 = arith.constant 0 : i32
    %c0_i32_1 = arith.constant 0 : i32
    return %c0_i32, %c0_i32_0 : i32, i32
  }
  func.func @transform_3(%arg0: i32) -> (i32, i32) {
    %c0_i32 = arith.constant 0 : i32
    %c0_i32_0 = arith.constant 0 : i32
    %c0_i32_1 = arith.constant 0 : i32
    return %c0_i32, %c0_i32_0 : i32, i32
  }
  func.func @transform_4(%arg0: i32) -> (i32, i32) {
    %c0_i32 = arith.constant 0 : i32
    %c0_i32_0 = arith.constant 0 : i32
    %c0_i32_1 = arith.constant 0 : i32
    return %c0_i32, %c0_i32_0 : i32, i32
  }
  func.func @transform_5(%arg0: i32) -> (i32, i32) {
    %c0_i32 = arith.constant 0 : i32
    %c0_i32_0 = arith.constant 0 : i32
    return %arg0, %c0_i32 : i32, i32
  }
  func.func @transform_6(%arg0: i32) -> (i32, i32) {
    %c0_i32 = arith.constant 0 : i32
    %c0_i32_0 = arith.constant 0 : i32
    return %arg0, %c0_i32 : i32, i32
  }
}

</mosaic_0001>

<bundles_post_ra>
// kernel: tpu_custom_call.1
= control target key start
LH: loop header
LB: loop body
LE: loop exit
PB: predicated region body
PF: predicated region fallthrough
CT: control target
= control target key end

     0   :  { %12 = vsyncpa [#allocation3], 0  ;;  %s570_s0 = inlined_call_operand.hbm [shape: f32[2,8,32], index: 0, kind: input, shape index: {}]   ;;  %s571_s1 = inlined_call_operand.hbm [shape: f32[32,32], index: 1, kind: input, shape index: {}]   ;;  %s572_s2 = inlined_call_operand.vmem [shape: f32[1,32], index: 2, kind: input, shape index: {}]   ;;  %s573_s3 = inlined_call_operand.hbm [shape: f32[32,32], index: 3, kind: input, shape index: {}]   ;;  %s574_s4 = inlined_call_operand.vmem [shape: f32[1,32], index: 4, kind: input, shape index: {}]   ;;  %s575_s5 = inlined_call_operand.hbm [shape: f32[2,128], index: 5, kind: output, shape index: {0}]   ;;  %s576_s6 = inlined_call_operand.hbm [shape: f32[2,128], index: 6, kind: output, shape index: {1}]  }
   0x1   :  { %13 = vsyncpa [#allocation6], 0 }
   0x2   :  { %14 = vsyncpa [#allocation4], 0 }
   0x3   :  { %15 = vsyncpa [#allocation10], 0  ;;  %s33_s23 = sshll.u32 %s571_s1, 4  ;;  %s483_s24 = smov [#allocation5]   ;;  %s34_s23 = int_to_ptr.hbm [resolvable:$true] %s33_s23 }
   0x4   :  { %s35_s25 = sshll.u32 %s483_s24, 4  ;;  %s20_s28 = sshll.u32 %s570_s0, 4  ;;  %s36_s25 = int_to_ptr.vmem [resolvable:$true] %s35_s25  ;;  %s21_s28 = int_to_ptr.hbm [resolvable:$true] %s20_s28 }
   0x5   :  { %s484_s29 = smov 128   ;;  %s485_s30 = smov 8  }
   0x6   :  { %41 = dma.hbm_to_vmem [thread:$0]  %s34_s23, 512, %s36_s25, [#allocation6], %s484_s29, %s484_s29, %s485_s30  }
   0x7   :  { %s486_s7 = smov [#allocation2]   ;;  %s48_s11 = sshll.u32 %s573_s3, 4  ;;  %s49_s11 = int_to_ptr.hbm [resolvable:$true] %s48_s11 }
   0x8   :  { %s22_s8 = sshll.u32 %s486_s7, 4  ;;  %s487_s1 = smov [#allocation7]   ;;  %s23_s8 = int_to_ptr.vmem [resolvable:$true] %s22_s8 }
   0x9   :  { %28 = dma.hbm_to_vmem [thread:$0]  %s21_s28, 256, %s23_s8, [#allocation3], %s484_s29, %s484_s29, %s485_s30  }
   0xa   :  { %s50_s12 = sshll.u32 %s487_s1, 4  ;;  %s51_s12 = int_to_ptr.vmem [resolvable:$true] %s50_s12 }
   0xb   :  { %56 = dma.hbm_to_vmem [thread:$0]  %s49_s11, 512, %s51_s12, [#allocation6], %s484_s29, %s484_s29, %s485_s30  }
   0xc   :  { %475 = dma.done.wait [#allocation3], 256  }
   0xd   :  { %476 = vsyncadd [#allocation3], 4294967040 }
   0xe   :  { %477 = dma.done.wait [#allocation6], 1024  }
   0xf   :  { %478 = vsyncadd [#allocation6], 4294966272  ;;  %v117_v0 = vlaneseq  ;;  %v76_v1 = vld [vmem:[#allocation5 + $0x18] sm:$0xff]  ;;  %v75_v3 = vld [vmem:[#allocation5 + $0x10] sm:$0xff]  ;;  %vm123_vm0 = vcmask 1041409   ;;  %vm81_vm1 = vcmask 261120  }
  0x10   :  { %v135_v2 = vld [vmem:[#allocation7 + $0x18] sm:$0xff]  ;;  %100 = vmatpush.msra.mxu0 %v76_v1  ;;  %v134_v4 = vld [vmem:[#allocation7 + $0x10] sm:$0xff]  ;;  %v74_v5 = vld [vmem:[#allocation5 + $0x8] sm:$0xff]  ;;  %vm184_vm3 = vcmask 58368   ;;  %v488_v45 = vmov 0   ;;  %vm230_vm4 = vcmask 64512  }
  0x11   :  { %155 = vmatpush.msra.mxu1 %v135_v2  ;;  %v535_v6 = vand.u32 127, %v117_v0  ;;  %v133_v7 = vld [vmem:[#allocation7 + $0x8] sm:$0xff]  ;;  %v73_v8 = vld [vmem:[#allocation5] sm:$0xff]  ;;  %v71_v9 = vld [vmem:[#allocation2] sm:$0xff]  ;;  %339 = vset.pattern.permute.xlu2 %v488_v45  ;;  %s309_s17 = sshll.u32 %s576_s6, 4  ;;  %s490_s18 = smov [#allocation8]   ;;  %s310_s17 = int_to_ptr.hbm [resolvable:$true] %s309_s17 }
  0x12   :  { %101 = vmatpush.msra.mxu0 %v75_v3  ;;  %v113_v10 = vld [vmem:[#allocation2 + $0x7] sm:$0x1]  ;;  %v114_v11 = vld [vmem:[#allocation2 + $0xf] sm:$0x1]  ;;  %v115_v12 = vld [vmem:[#allocation2 + $0x1] sm:$0x1]  ;;  %248 = vmatpush.msra.mxu2 %v71_v9 }
  0x13   :  { %156 = vmatpush.msra.mxu1 %v134_v4  ;;  %v132_v13 = vld [vmem:[#allocation7] sm:$0xff]  ;;  %v116_v14 = vld [vmem:[#allocation2 + $0x9] sm:$0x1]  ;;  %v122_v15 = vrot.slane %v114_v11, 7  ;;  %vm119_vm2 = vcmp.lt.s32.totalorder %v535_v6, 16  ;;  %338 = vset.pattern.permute.xlu1 %v488_v45  ;;  %s296_s19 = sshll.u32 %s490_s18, 4  ;;  %s297_s19 = int_to_ptr.vmem [resolvable:$true] %s296_s19 }
  0x14   :  { %102 = vmatpush.msra.mxu0 %v74_v5  ;;  %v128_v16 = vrot.slane %v116_v14, 7  ;;  %v72_v17 = vld [vmem:[#allocation2 + $0x8] sm:$0xff]  ;;  %v341_v21 = vld [vmem:[%s572_s2] ss:$0 sm:$0xff]  ;;  %340 = vset.pattern.permute.xlu0 %v488_v45  ;;  %s489_s2 = smov [#allocation9]   ;;  %s298_s22 = sshll.u32 %s575_s5, 4  ;;  %s299_s22 = int_to_ptr.hbm [resolvable:$true] %s298_s22 }
  0x15   :  { %157 = vmatpush.msra.mxu1 %v133_v7  ;;  %v124_v18 = vsel %vm123_vm0, %v122_v15, %v113_v10  ;;  %275 = vmatpush.msra.mxu3 %v72_v17  ;;  %v342_v22 = vld [vmem:[%s574_s4] ss:$0 sm:$0xff]  ;;  %s307_s4 = sshll.u32 %s489_s2, 4  ;;  %s308_s4 = int_to_ptr.vmem [resolvable:$true] %s307_s4 }
  0x16   :  { %103 = vmatpush.msra.mxu0 %v73_v8  ;;  %v129_v19 = vsel %vm123_vm0, %v128_v16, %v115_v12 }
  0x17   :  { %158 = vmatpush.msra.mxu1 %v132_v13  ;;  %325 = vmatmul.msk.f32.vlgmr.msra.gmra.mxu0 %vm81_vm1, %v71_v9  ;;  %v131_v20 = vsel %vm119_vm2, %v124_v18, %v129_v19 }
  0x18   :  { %327 = vmatmul.msk.f32.vlgmr.msra.gmra.mxu1 %vm81_vm1, %v131_v20 }
  0x1f   :  { %326 = vmatmul.msk.f32.gmra.mxu0 %vm81_vm1, %v72_v17 }
  0x94   :  { %v105_v23 = vpop.f32.mrf.mxu0 }
  0x95   :  { %v106_v24 = vadd.f32 %v341_v21, %v105_v23  ;;  %v160_v25 = vpop.f32.mrf.mxu1 }
  0x96   :  { %v161_v26 = vadd.f32 %v342_v22, %v160_v25 }
  0x97   :  { %343 = vtanh.f32 %v106_v24 }
  0x98   :  { %345 = vtanh.f32 %v161_v26 }
  0x9c   :  { %v108_v27 = vpop.f32.mrf.mxu0 }
  0x9d   :  { %v344_v28 = vpop.eup %343  ;;  %v109_v29 = vadd.f32 %v341_v21, %v108_v27 }
  0x9e   :  { %v346_v30 = vpop.eup %345 }
  0x9f   :  { %347 = vtanh.f32 %v109_v29  ;;  %v166_v31 = vperm.slane %v346_v30, 0  ;;  %v165_v33 = vrot.slane %v346_v30, 1 }
  0xa1   :  { %v170_v32 = vmul.f32 %v344_v28, %v166_v31  ;;  %v167_v36 = vperm.slane %v165_v33, 0 }
  0xa3   :  { %v172_v34 = vsel %vm81_vm1, %v170_v32, 0.0 }
  0xa4   :  { %173 = vadd.xlane.f32.xlu0 %v172_v34 }
  0xa5   :  { %v348_v35 = vpop.eup %347 }
  0xa6   :  { %v171_v37 = vmul.f32 %v348_v35, %v167_v36 }
  0xa8   :  { %v175_v38 = vsel %vm81_vm1, %v171_v37, 0.0 }
  0xac   :  { %176 = vadd.xlane.f32.xlu0 %v175_v38 }
 0x117   :  { %v174_v39 = vpop.xlane.xlu0 %173 }
 0x118   :  { %v180_v41 = vperm.slane %v174_v39, %v535_v6 }
 0x11f   :  { %v177_v40 = vpop.xlane.xlu0 %176 }
 0x120   :  { %v181_v42 = vperm.slane %v177_v40, %v535_v6 }
 0x122   :  { %v182_v43 = vsel %vm123_vm0, %v181_v42, %v180_v41 }
 0x123   :  { %v185_v44 = vsel %vm184_vm3, %v182_v43, -inf }
 0x124   :  { %186 = vmax.xlane.f32.xlu1 %v185_v44 }
 0x197   :  { %v187_v46 = vpop.xlane.xlu1 %186 }
 0x198   :  { %v189_v47 = vperm.slane %v187_v46, 0  ;;  %v190_v48 = vperm.slane %v187_v46, 1 }
 0x19a   :  { %v193_v49 = vsub.f32 %v174_v39, %v189_v47  ;;  %v194_v50 = vsub.f32 %v177_v40, %v190_v48 }
 0x19c   :  { %v195_v51 = vmul.f32 1.442695, %v193_v49  ;;  %v197_v52 = vmul.f32 1.442695, %v194_v50 }
 0x19e   :  { %349 = vpow2.f32 %v195_v51 }
 0x19f   :  { %351 = vpow2.f32 %v197_v52 }
 0x1a4   :  { %v350_v53 = vpop.eup %349 }
 0x1a5   :  { %v352_v54 = vpop.eup %351  ;;  %202 = vperm.xlu1 %338, %v350_v53  }
 0x1a6   :  { %205 = vperm.xlu2 %339, %v352_v54  }
 0x200   :  { %v206_v55 = vpop.permute.xlu2 %205 }
 0x201   :  { %v208_v57 = vperm.slane %v206_v55, %v535_v6 }
 0x217   :  { %v203_v56 = vpop.permute.xlu1 %202 }
 0x218   :  { %v207_v58 = vperm.slane %v203_v56, %v535_v6 }
 0x21a   :  { %v209_v59 = vsel %vm123_vm0, %v208_v57, %v207_v58 }
 0x21b   :  { %v211_v60 = vsel %vm184_vm3, %v209_v59, 0.0 }
 0x21c   :  { %212 = vadd.xlane.f32.xlu2 %v211_v60 }
 0x28f   :  { %v213_v61 = vpop.xlane.xlu2 %212 }
 0x290   :  { %353 = vrcp.f32 %v213_v61 }
 0x296   :  { %v354_v62 = vpop.eup %353 }
 0x297   :  { %v215_v63 = vmul.f32 %v354_v62, %v213_v61 }
 0x299   :  { %v216_v0 = vsub.f32 2.0, %v215_v63 }
 0x29b   :  { %v217_v1 = vmul.f32 %v354_v62, %v216_v0 }
 0x29d   :  { %v219_v2 = vperm.slane %v217_v1, 0  ;;  %v220_v3 = vperm.slane %v217_v1, 1 }
 0x29f   :  { %v224_v4 = vmul.f32 %v352_v54, %v220_v3  ;;  %v223_v5 = vmul.f32 %v350_v53, %v219_v2 }
 0x2a1   :  { %255 = vperm.xlu0 %340, %v224_v4   ;;  %227 = vperm.xlu1 %338, %v223_v5  }
 0x313   :  { %v256_v7 = vpop.permute.xlu0 %255  ;;  %v228_v8 = vpop.permute.xlu1 %227 }
 0x314   :  { %v257_v9 = vperm.slane %v256_v7, %v535_v6  ;;  %v229_v10 = vperm.slane %v228_v8, %v535_v6 }
 0x316   :  { %328 = vmatmul.msk.f32.vlgmr.msra.gmra.mxu2 %vm230_vm4, %v229_v10  ;;  %v286_v11 = vsel %vm123_vm0, %v257_v9, %v229_v10  ;;  %329 = vmatmul.msk.f32.vlgmr.msra.gmra.mxu3 %vm230_vm4, %v257_v9 }
 0x317   :  { %v288_v12 = vsel %vm230_vm4, %v286_v11, 0.0 }
 0x318   :  { %290 = vst [vmem:[#allocation9] sm:$0x3] %v288_v12 }
 0x319   :  { %312 = dma.vmem_to_hbm [thread:$0]  %s308_s4, 32, %s310_s17, [#allocation10]  }
 0x399   :  { %v277_v13 = vpop.f32.mrf.mxu3  ;;  %v250_v14 = vpop.f32.mrf.mxu2 }
 0x39a   :  { %v282_v6 = vrot.slane %v277_v13, 7 }
 0x39c   :  { %v283_v15 = vsel %vm123_vm0, %v282_v6, %v250_v14 }
 0x39d   :  { %v285_v16 = vsel %vm81_vm1, %v283_v15, 0.0 }
 0x39e   :  { %289 = vst [vmem:[#allocation8] sm:$0x3] %v285_v16 }
 0x39f   :  { %301 = dma.vmem_to_hbm [thread:$0]  %s297_s19, 32, %s299_s22, [#allocation4]  }
 0x3a0   :  { %479 = dma.done.wait [#allocation4], 32  }
 0x3a1   :  { %480 = vsyncadd [#allocation4], 4294967264 }
 0x3a2   :  { %481 = dma.done.wait [#allocation10], 32  }
 0x3a3   :  { %482 = vsyncadd [#allocation10], 4294967264 }
 0x3a4   :  { %321 = vsyncpa [#allocation3], 1 }
 0x3a5   :  { %322 = vsyncpa [#allocation6], 1 }
 0x3a6   :  { %323 = vsyncpa [#allocation4], 1 }
 0x3a7   :  { %324 = vsyncpa [#allocation10], 1 }

</bundles_post_ra>
